<compile_context>
chip_gen: v6e
topology: v6e:2x2x1
jax: 0.10.0
libtpu: 0.0.40
codegen_flags: <defaults>
</compile_context>

<pallas_src>
import functools

import jax
import jax.numpy as jnp
from jax.experimental import pallas as pl
from jax.experimental.pallas import tpu as pltpu

_VMEM_LIMIT = 32 * 1024 * 1024  # explicit scoped-VMEM budget; safe on v5e/v6e/v7x


def _round_up(n, m):
    return ((n + m - 1) // m) * m


def _row_tile(n, target=512):
    """Row tile: multiple of 8, <= target, >= 2 grid steps whenever possible."""
    half = -(-n // 2)
    return max(8, min(target, _round_up(half, 8)))


def _spatial_tile(n, target=512):
    """Largest multiple-of-8 divisor of n that is <= target (or n itself)."""
    if n <= target:
        return n
    for t in range(target, 7, -1):
        if n % t == 0 and t % 8 == 0:
            return t
    return n


# ---------------------------------------------------------------------------
# Kernel bodies
# ---------------------------------------------------------------------------
def _token_mlp_kernel(x_ref, w1_ref, s1_ref, t1_ref, w2_ref, b2_ref, o_ref):
    """rows x Cin -> Linear(no bias) -> folded-BN affine -> ReLU -> Linear + b."""
    x = x_ref[...]
    y = jnp.dot(x, w1_ref[...], preferred_element_type=jnp.float32)
    y = y * s1_ref[...] + t1_ref[...]
    y = jnp.maximum(y, 0.0)
    z = jnp.dot(y, w2_ref[...], preferred_element_type=jnp.float32) + b2_ref[...]
    o_ref[...] = z.astype(o_ref.dtype)


def _linear_kernel(x_ref, w_ref, b_ref, o_ref):
    y = jnp.dot(x_ref[...], w_ref[...], preferred_element_type=jnp.float32)
    o_ref[...] = (y + b_ref[...]).astype(o_ref.dtype)


def _gap_mean_kernel(h_ref, w_ref, c_ref, o_ref, acc_ref, *, inv_n):
    """Mean over the spatial axis of (h + w + c); reduction grid + f32 acc."""
    @pl.when(pl.program_id(0) == 0)
    def _():
        acc_ref[...] = jnp.zeros_like(acc_ref)

    s = h_ref[...] + w_ref[...] + c_ref[...]                  # (B, TS, C)
    acc_ref[...] += jnp.sum(s, axis=1, dtype=jnp.float32)

    @pl.when(pl.program_id(0) == pl.num_programs(0) - 1)
    def _():
        o_ref[...] = (acc_ref[...] * inv_n).astype(o_ref.dtype)


def _combine_proj_kernel(h_ref, w_ref, c_ref, a_ref, wp_ref, bp_ref, o_ref):
    """(h*a0 + w*a1 + c*a2) @ Wp + bp, fused per (batch, spatial-tile)."""
    a = a_ref[...]                                            # (1, 3, C)
    mix = (h_ref[0] * a[:, 0, :]
           + w_ref[0] * a[:, 1, :]
           + c_ref[0] * a[:, 2, :])                           # (TS, C)
    y = jnp.dot(mix, wp_ref[...], preferred_element_type=jnp.float32) + bp_ref[...]
    o_ref[...] = y[None].astype(o_ref.dtype)


# ---------------------------------------------------------------------------
# pallas_call wrappers
# ---------------------------------------------------------------------------
def _token_mlp(x2d, w1, s1, t1, w2, b2):
    n, cin = x2d.shape
    cmid = w1.shape[1]
    cout = w2.shape[1]
    tm = _row_tile(n)
    n_pad = _round_up(n, tm)
    if n_pad != n:
        x2d = jnp.concatenate([x2d, jnp.zeros((n_pad - n, cin), x2d.dtype)], axis=0)
    out = pl.pallas_call(
        _token_mlp_kernel,
        out_shape=jax.ShapeDtypeStruct((n_pad, cout), x2d.dtype),
        grid=(n_pad // tm,),
        in_specs=[
            pl.BlockSpec((tm, cin), lambda i: (i, 0)),
            pl.BlockSpec((cin, cmid), lambda i: (0, 0)),
            pl.BlockSpec((1, cmid), lambda i: (0, 0)),
            pl.BlockSpec((1, cmid), lambda i: (0, 0)),
            pl.BlockSpec((cmid, cout), lambda i: (0, 0)),
            pl.BlockSpec((1, cout), lambda i: (0, 0)),
        ],
        out_specs=pl.BlockSpec((tm, cout), lambda i: (i, 0)),
        compiler_params=pltpu.CompilerParams(
            dimension_semantics=("parallel",),
            vmem_limit_bytes=_VMEM_LIMIT,
        ),
        cost_estimate=pl.CostEstimate(
            flops=2 * n_pad * cmid * (cin + cout) + 3 * n_pad * cmid,
            transcendentals=0,
            bytes_accessed=4 * (n_pad * (cin + cout) + cin * cmid + cmid * cout),
        ),
    )(x2d, w1, s1.reshape(1, cmid), t1.reshape(1, cmid), w2, b2.reshape(1, cout))
    return out[:n]


def _linear(x2d, w, b):
    n, cin = x2d.shape
    cout = w.shape[1]
    tm = _row_tile(n)
    n_pad = _round_up(n, tm)
    if n_pad != n:
        x2d = jnp.concatenate([x2d, jnp.zeros((n_pad - n, cin), x2d.dtype)], axis=0)
    out = pl.pallas_call(
        _linear_kernel,
        out_shape=jax.ShapeDtypeStruct((n_pad, cout), x2d.dtype),
        grid=(n_pad // tm,),
        in_specs=[
            pl.BlockSpec((tm, cin), lambda i: (i, 0)),
            pl.BlockSpec((cin, cout), lambda i: (0, 0)),
            pl.BlockSpec((1, cout), lambda i: (0, 0)),
        ],
        out_specs=pl.BlockSpec((tm, cout), lambda i: (i, 0)),
        compiler_params=pltpu.CompilerParams(
            dimension_semantics=("parallel",),
            vmem_limit_bytes=_VMEM_LIMIT,
        ),
        cost_estimate=pl.CostEstimate(
            flops=2 * n_pad * cin * cout,
            transcendentals=0,
            bytes_accessed=4 * (n_pad * (cin + cout) + cin * cout),
        ),
    )(x2d, w, b.reshape(1, cout))
    return out[:n]


def _gap_mean(h3, w3, c3):
    b, hw, c = h3.shape
    ts = _spatial_tile(hw)
    kernel = functools.partial(_gap_mean_kernel, inv_n=1.0 / hw)
    spec = pl.BlockSpec((b, ts, c), lambda s: (0, s, 0))
    return pl.pallas_call(
        kernel,
        out_shape=jax.ShapeDtypeStruct((b, c), h3.dtype),
        grid=(hw // ts,),
        in_specs=[spec, spec, spec],
        out_specs=pl.BlockSpec((b, c), lambda s: (0, 0)),
        scratch_shapes=[pltpu.VMEM((b, c), jnp.float32)],
        compiler_params=pltpu.CompilerParams(
            dimension_semantics=("arbitrary",),
            vmem_limit_bytes=_VMEM_LIMIT,
        ),
    )(h3, w3, c3)


def _combine_proj(h3, w3, c3, a, wp, bp):
    b, hw, c = h3.shape
    ts = _spatial_tile(hw)
    spec = pl.BlockSpec((1, ts, c), lambda i, s: (i, s, 0))
    return pl.pallas_call(
        _combine_proj_kernel,
        out_shape=jax.ShapeDtypeStruct((b, hw, c), h3.dtype),
        grid=(b, hw // ts),
        in_specs=[
            spec, spec, spec,
            pl.BlockSpec((1, 3, c), lambda i, s: (i, 0, 0)),
            pl.BlockSpec((c, c), lambda i, s: (0, 0)),
            pl.BlockSpec((1, c), lambda i, s: (0, 0)),
        ],
        out_specs=spec,
        compiler_params=pltpu.CompilerParams(
            dimension_semantics=("parallel", "parallel"),
            vmem_limit_bytes=_VMEM_LIMIT,
        ),
    )(h3, w3, c3, a, wp, bp.reshape(1, c))


# ---------------------------------------------------------------------------
# HireMLP forward (Pallas path)
# ---------------------------------------------------------------------------
def hire_mlp_forward(x, params, *, pixel=2, step=1):
    """x: (B, C, H, W) float32 -> (B, C, H, W)."""
    B, C, H, W = x.shape
    pad_h = (pixel - H % pixel) % pixel
    pad_w = (pixel - W % pixel) % pixel
    Hp, Wp = H + pad_h, W + pad_w
    Hh, Ww = Hp // pixel, Wp // pixel

    # ---- h branch: cross-region roll + circular pad + inner-region regroup ----
    h = jnp.roll(x, step, axis=2) if step else x
    if pad_h:
        h = jnp.concatenate([h, h[:, :, :pad_h, :]], axis=2)        # circular pad
    h = h.reshape(B, C, Hh, pixel, W).transpose(0, 2, 4, 1, 3)      # (B,Hh,W,C,pix)
    h_tok = h.reshape(B * Hh * W, C * pixel)
    h_tok = _token_mlp(h_tok, params["w_h1"], params["s_h1"], params["t_h1"],
                       params["w_h2"], params["b_h2"])
    h = h_tok.reshape(B, Hh, W, C, pixel).transpose(0, 1, 4, 2, 3)
    h = h.reshape(B, Hp, W, C)[:, :H]
    if step:
        h = jnp.roll(h, -step, axis=1)                              # (B,H,W,C)

    # ---- w branch ----
    w = jnp.roll(x, step, axis=3) if step else x
    if pad_w:
        w = jnp.concatenate([w, w[:, :, :, :pad_w]], axis=3)
    w = w.reshape(B, C, H, Ww, pixel).transpose(0, 2, 3, 1, 4)      # (B,H,Ww,C,pix)
    w_tok = w.reshape(B * H * Ww, C * pixel)
    w_tok = _token_mlp(w_tok, params["w_w1"], params["s_w1"], params["t_w1"],
                       params["w_w2"], params["b_w2"])
    w = w_tok.reshape(B, H, Ww, C, pixel).transpose(0, 1, 2, 4, 3)
    w = w.reshape(B, H, Wp, C)[:, :, :W]
    if step:
        w = jnp.roll(w, -step, axis=2)                              # (B,H,W,C)

    # ---- c branch (mlp_c) ----
    x_cl = x.transpose(0, 2, 3, 1)                                  # (B,H,W,C)
    c = _linear(x_cl.reshape(B * H * W, C), params["w_c"], params["b_c"])
    c = c.reshape(B, H, W, C)

    # ---- branch re-weighting ----
    hw = H * W
    h3 = h.reshape(B, hw, C)
    w3 = w.reshape(B, hw, C)
    c3 = c.reshape(B, hw, C)
    a = _gap_mean(h3, w3, c3)                                       # (B, C)
    # TODO(synk): reweight MLP + softmax kept in plain JAX (tiny BxC work).
    a = jax.nn.gelu(a @ params["w_r1"] + params["b_r1"], approximate=False)
    a = a @ params["w_r2"] + params["b_r2"]                         # (B, 3C)
    a = a.reshape(B, C, 3).transpose(0, 2, 1)                       # (B, 3, C)
    a = jax.nn.softmax(a, axis=1)

    # ---- fused combine + proj (1x1 conv); proj_drop is identity (p=0) ----
    out = _combine_proj(h3, w3, c3, a, params["w_p"], params["b_p"])
    return out.reshape(B, H, W, C).transpose(0, 3, 1, 2)


# ---------------------------------------------------------------------------
# Pure-JAX reference mirroring the PyTorch forward (channel-first)
# ---------------------------------------------------------------------------
def hire_mlp_reference(x, params, *, pixel=2, step=1):
    B, C, H, W = x.shape
    pad_h = (pixel - H % pixel) % pixel
    pad_w = (pixel - W % pixel) % pixel
    Hp, Wp = H + pad_h, W + pad_w

    def conv1x1(z, weight, bias=None):
        y = jnp.einsum("bihw,io->bohw", z, weight)
        if bias is not None:
            y = y + bias[None, :, None, None]
        return y

    h = jnp.roll(x, step, axis=2) if step else x
    w = jnp.roll(x, step, axis=3) if step else x
    if pad_h:
        h = jnp.concatenate([h, h[:, :, :pad_h, :]], axis=2)
    if pad_w:
        w = jnp.concatenate([w, w[:, :, :, :pad_w]], axis=3)
    h = (h.reshape(B, C, Hp // pixel, pixel, W).transpose(0, 1, 3, 2, 4)
          .reshape(B, C * pixel, Hp // pixel, W))
    w = (w.reshape(B, C, H, Wp // pixel, pixel).transpose(0, 1, 4, 2, 3)
          .reshape(B, C * pixel, H, Wp // pixel))

    h = conv1x1(h, params["w_h1"])
    h = h * params["s_h1"][None, :, None, None] + params["t_h1"][None, :, None, None]
    h = jnp.maximum(h, 0.0)
    h = conv1x1(h, params["w_h2"], params["b_h2"])

    w = conv1x1(w, params["w_w1"])
    w = w * params["s_w1"][None, :, None, None] + params["t_w1"][None, :, None, None]
    w = jnp.maximum(w, 0.0)
    w = conv1x1(w, params["w_w2"], params["b_w2"])

    h = (h.reshape(B, C, pixel, Hp // pixel, W).transpose(0, 1, 3, 2, 4)
          .reshape(B, C, Hp, W))[:, :, :H, :]
    w = (w.reshape(B, C, pixel, H, Wp // pixel).transpose(0, 1, 3, 4, 2)
          .reshape(B, C, H, Wp))[:, :, :, :W]
    if step:
        h = jnp.roll(h, -step, axis=2)
        w = jnp.roll(w, -step, axis=3)

    c = conv1x1(x, params["w_c"], params["b_c"])

    a = (h + w + c).reshape(B, C, H * W).mean(axis=2)               # (B, C)
    a = jax.nn.gelu(a @ params["w_r1"] + params["b_r1"], approximate=False)
    a = a @ params["w_r2"] + params["b_r2"]
    a = a.reshape(B, C, 3).transpose(2, 0, 1)                       # (3, B, C)
    a = jax.nn.softmax(a, axis=0)

    out = (h * a[0][:, :, None, None] + w * a[1][:, :, None, None]
           + c * a[2][:, :, None, None])
    return conv1x1(out, params["w_p"], params["b_p"])


# ---------------------------------------------------------------------------
# Deterministic parameters (BN folded to eval-mode scale/shift)
# ---------------------------------------------------------------------------
def init_params(key, dim, pixel):
    cin = dim * pixel
    cmid = dim // 2
    chid = max(dim // 4, 1)
    eps = 1e-5
    ks = list(jax.random.split(key, 24))

    def nrm(shape, scale=0.2):
        return (scale * jax.random.normal(ks.pop(), shape)).astype(jnp.float32)

    def bn_fold():
        gamma = 1.0 + nrm((cmid,), 0.1)
        beta = nrm((cmid,))
        mean = nrm((cmid,))
        var = jnp.abs(nrm((cmid,))) + 1.0
        s = gamma / jnp.sqrt(var + eps)
        t = beta - mean * s
        return s.astype(jnp.float32), t.astype(jnp.float32)

    s_h1, t_h1 = bn_fold()
    s_w1, t_w1 = bn_fold()
    return dict(
        w_h1=nrm((cin, cmid)), s_h1=s_h1, t_h1=t_h1,
        w_h2=nrm((cmid, cin)), b_h2=nrm((cin,)),
        w_w1=nrm((cin, cmid)), s_w1=s_w1, t_w1=t_w1,
        w_w2=nrm((cmid, cin)), b_w2=nrm((cin,)),
        w_c=nrm((dim, dim)), b_c=nrm((dim,)),
        w_r1=nrm((dim, chid)), b_r1=nrm((chid,)),
        w_r2=nrm((chid, 3 * dim)), b_r2=nrm((3 * dim,)),
        w_p=nrm((dim, dim)), b_p=nrm((dim,)),
    )


if __name__ == "__main__":
    key = jax.random.PRNGKey(0)
    k_x1, k_x2, k_p = jax.random.split(key, 3)

    dim, pixel, step = 4, 2, 1
    params = init_params(k_p, dim, pixel)

    # Shape 1: spatial dims divisible by pixel (no pixel padding).
    x1 = jax.random.normal(k_x1, (2, dim, 16, 16), dtype=jnp.float32)
    out1 = jax.block_until_ready(hire_mlp_forward(x1, params, pixel=pixel, step=step))
    ref1 = hire_mlp_reference(x1, params, pixel=pixel, step=step)
    assert out1.shape == ref1.shape, (out1.shape, ref1.shape)
    assert jnp.allclose(out1, ref1, atol=2e-2, rtol=2e-2), \
        float(jnp.max(jnp.abs(out1 - ref1)))

    # Shape 2: odd height exercises the circular pixel-padding path.
    x2 = jax.random.normal(k_x2, (2, dim, 15, 16), dtype=jnp.float32)
    out2 = jax.block_until_ready(hire_mlp_forward(x2, params, pixel=pixel, step=step))
    ref2 = hire_mlp_reference(x2, params, pixel=pixel, step=step)
    assert out2.shape == ref2.shape, (out2.shape, ref2.shape)
    assert jnp.allclose(out2, ref2, atol=2e-2, rtol=2e-2), \
        float(jnp.max(jnp.abs(out2 - ref2)))

    print("KERNEL_OK")
</pallas_src>

<mosaic_0001>
module attributes {stable_mosaic.version = 11 : i64} {
  func.func @_token_mlp_kernel(%arg0: i32, %arg1: memref<128x8xf32, #tpu.memory_space<vmem>>, %arg2: memref<8x2xf32, #tpu.memory_space<vmem>>, %arg3: memref<1x2xf32, #tpu.memory_space<vmem>>, %arg4: memref<1x2xf32, #tpu.memory_space<vmem>>, %arg5: memref<2x8xf32, #tpu.memory_space<vmem>>, %arg6: memref<1x8xf32, #tpu.memory_space<vmem>>, %arg7: memref<128x8xf32, #tpu.memory_space<vmem>>) attributes {dimension_semantics = [#tpu.dimension_semantics<parallel>], iteration_bounds = array<i64: 2>, scalar_prefetch = 0 : i64, scratch_operands = 0 : i64, tpu.core_type = #tpu.core_type<tc>, window_params = [{transform_indices = @transform_0, window_bounds = array<i64: 128, 8>}, {pipeline_mode = #tpu.pipeline_mode<synchronous>, transform_indices = @transform_1, window_bounds = array<i64: 8, 2>}, {pipeline_mode = #tpu.pipeline_mode<synchronous>, transform_indices = @transform_2, window_bounds = array<i64: 1, 2>}, {pipeline_mode = #tpu.pipeline_mode<synchronous>, transform_indices = @transform_3, window_bounds = array<i64: 1, 2>}, {pipeline_mode = #tpu.pipeline_mode<synchronous>, transform_indices = @transform_4, window_bounds = array<i64: 2, 8>}, {pipeline_mode = #tpu.pipeline_mode<synchronous>, transform_indices = @transform_5, window_bounds = array<i64: 1, 8>}, {transform_indices = @transform_6, window_bounds = array<i64: 128, 8>}]} {
    %c0 = arith.constant 0 : index
    %c0_0 = arith.constant 0 : index
    %0 = vector.load %arg1[%c0, %c0_0] : memref<128x8xf32, #tpu.memory_space<vmem>>, vector<128x8xf32>
    %c0_1 = arith.constant 0 : index
    %c0_2 = arith.constant 0 : index
    %1 = vector.load %arg2[%c0_1, %c0_2] : memref<8x2xf32, #tpu.memory_space<vmem>>, vector<8x2xf32>
    %cst = arith.constant dense<0.000000e+00> : vector<128x2xf32>
    %2 = tpu.matmul %0, %1, %cst {dimension_numbers = #tpu.dot_dimension_numbers<[1], [0], [0], [1], [0, 0, 1, 1], [], []>} : vector<128x8xf32>, vector<8x2xf32>, vector<128x2xf32> -> vector<128x2xf32>
    %c0_3 = arith.constant 0 : index
    %c0_4 = arith.constant 0 : index
    %3 = vector.load %arg3[%c0_3, %c0_4] : memref<1x2xf32, #tpu.memory_space<vmem>>, vector<1x2xf32>
    %4 = vector.broadcast %3 : vector<1x2xf32> to vector<128x2xf32>
    %5 = arith.mulf %2, %4 : vector<128x2xf32>
    %c0_5 = arith.constant 0 : index
    %c0_6 = arith.constant 0 : index
    %6 = vector.load %arg4[%c0_5, %c0_6] : memref<1x2xf32, #tpu.memory_space<vmem>>, vector<1x2xf32>
    %7 = vector.broadcast %6 : vector<1x2xf32> to vector<128x2xf32>
    %8 = arith.addf %5, %7 : vector<128x2xf32>
    %cst_7 = arith.constant 0.000000e+00 : f32
    %9 = vector.broadcast %cst_7 : f32 to vector<128x2xf32>
    %10 = arith.maximumf %8, %9 : vector<128x2xf32>
    %c0_8 = arith.constant 0 : index
    %c0_9 = arith.constant 0 : index
    %11 = vector.load %arg5[%c0_8, %c0_9] : memref<2x8xf32, #tpu.memory_space<vmem>>, vector<2x8xf32>
    %cst_10 = arith.constant dense<0.000000e+00> : vector<128x8xf32>
    %12 = tpu.matmul %10, %11, %cst_10 {dimension_numbers = #tpu.dot_dimension_numbers<[1], [0], [0], [1], [0, 0, 1, 1], [], []>} : vector<128x2xf32>, vector<2x8xf32>, vector<128x8xf32> -> vector<128x8xf32>
    %c0_11 = arith.constant 0 : index
    %c0_12 = arith.constant 0 : index
    %13 = vector.load %arg6[%c0_11, %c0_12] : memref<1x8xf32, #tpu.memory_space<vmem>>, vector<1x8xf32>
    %14 = vector.broadcast %13 : vector<1x8xf32> to vector<128x8xf32>
    %15 = arith.addf %12, %14 : vector<128x8xf32>
    %c0_13 = arith.constant 0 : index
    %c0_14 = arith.constant 0 : index
    %16 = vector.load %arg7[%c0_13, %c0_14] : memref<128x8xf32, #tpu.memory_space<vmem>>, vector<128x8xf32>
    tpu.vector_store %arg7[%c0_13, %c0_14], %15 {strides = array<i32>} : memref<128x8xf32, #tpu.memory_space<vmem>>, vector<128x8xf32>,
    return
  }
  func.func @transform_0(%arg0: i32) -> (i32, i32) {
    %c0_i32 = arith.constant 0 : i32
    %c0_i32_0 = arith.constant 0 : i32
    return %arg0, %c0_i32 : i32, i32
  }
  func.func @transform_1(%arg0: i32) -> (i32, i32) {
    %c0_i32 = arith.constant 0 : i32
    %c0_i32_0 = arith.constant 0 : i32
    %c0_i32_1 = arith.constant 0 : i32
    return %c0_i32, %c0_i32_0 : i32, i32
  }
  func.func @transform_2(%arg0: i32) -> (i32, i32) {
    %c0_i32 = arith.constant 0 : i32
    %c0_i32_0 = arith.constant 0 : i32
    %c0_i32_1 = arith.constant 0 : i32
    return %c0_i32, %c0_i32_0 : i32, i32
  }
  func.func @transform_3(%arg0: i32) -> (i32, i32) {
    %c0_i32 = arith.constant 0 : i32
    %c0_i32_0 = arith.constant 0 : i32
    %c0_i32_1 = arith.constant 0 : i32
    return %c0_i32, %c0_i32_0 : i32, i32
  }
  func.func @transform_4(%arg0: i32) -> (i32, i32) {
    %c0_i32 = arith.constant 0 : i32
    %c0_i32_0 = arith.constant 0 : i32
    %c0_i32_1 = arith.constant 0 : i32
    return %c0_i32, %c0_i32_0 : i32, i32
  }
  func.func @transform_5(%arg0: i32) -> (i32, i32) {
    %c0_i32 = arith.constant 0 : i32
    %c0_i32_0 = arith.constant 0 : i32
    %c0_i32_1 = arith.constant 0 : i32
    return %c0_i32, %c0_i32_0 : i32, i32
  }
  func.func @transform_6(%arg0: i32) -> (i32, i32) {
    %c0_i32 = arith.constant 0 : i32
    %c0_i32_0 = arith.constant 0 : i32
    return %arg0, %c0_i32 : i32, i32
  }
}

</mosaic_0001>

<bundles_post_ra>
// kernel: tpu_custom_call.1
= control target key start
LH: loop header
LB: loop body
LE: loop exit
PB: predicated region body
PF: predicated region fallthrough
CT: control target
= control target key end

     0   :  { %s990_s21 = smov 0   ;;  %s1149_s0 = inlined_call_operand.vmem [shape: f32[256,8], index: 0, kind: input, shape index: {}]   ;;  %s1150_s1 = inlined_call_operand.vmem [shape: f32[8,2], index: 1, kind: input, shape index: {}]   ;;  %s1151_s2 = inlined_call_operand.vmem [shape: f32[1,2], index: 2, kind: input, shape index: {}]   ;;  %s1152_s3 = inlined_call_operand.vmem [shape: f32[1,2], index: 3, kind: input, shape index: {}]   ;;  %s1153_s4 = inlined_call_operand.vmem [shape: f32[2,8], index: 4, kind: input, shape index: {}]   ;;  %s1154_s5 = inlined_call_operand.vmem [shape: f32[1,8], index: 5, kind: input, shape index: {}]   ;;  %s1155_s6 = inlined_call_operand.vmem [shape: f32[256,8], index: 6, kind: output, shape index: {}]  }
   0x1 LB: > { %s806_s22 = sadd.s32 4294967295, %s953_s21   ;;  %p810_p0 = scmp.ge.s32.totalorder %s953_s21, 1  ;;  %s953_s21 = sphi %s990_s21, %s16_s21  }
   0x2   : > { %p213_p1 = scmp.lt.s32.totalorder %s953_s21, 3 }
   0x4   : > { %p214_p2 = pnand %p810_p0, %p213_p1 }
   0x5   : > { %s811_s25 = sshll.u32 (!%p214_p2), %s806_s22, 4 }
   0x6   : > { %217 = sbr.rel (%p214_p2) target bundleno = 444 (0x1bc), region = 44  ;;  %p244_p3 = scmp.lt.s32.totalorder (!%p214_p2), %s811_s25, 31 }
   0xb   : > { %v271_v0 = vld [vmem:[%s1150_s1] sm:$0xff]  ;;  %s1157_s25 = smov (!%p244_p3, %s811_s25), 31  ;;  %vm272_vm0 = vcmask 64512   ;;  %vm585_vm1 = vcmask 1041408   ;;  %vm536_vm2 = vcmask 15360  }
   0xc   : > { %887 = vmatprep.subr.mxu0 %v271_v0  ;;  %s812_s26 = sshll.u32 %s1157_s25, 3  ;;  %v528_v17 = vld [vmem:[%s1153_s4] sm:$0x3] }
   0xd   : > { %888 = vmatpush3.msra.mxu0 %v271_v0  ;;  %s1009_s29 = scalar_lea.vmem %s1149_s0, %s812_s26  ;;  %913 = vmatprep.subr.msk.mxu1 %vm585_vm1, %v528_v17  ;;  %v1049_v18 = vld [vmem:[%s1151_s2] ss:$0 sm:$0xff]  ;;  %s1112_s16 = scalar_lea.vmem %s1155_s6, %s812_s26 }
   0xe   : > { %v255_v1 = vld [vmem:[%s1009_s29] sm:$0xff]  ;;  %v256_v2 = vld [vmem:[%s1009_s29 + $0x8] sm:$0xff]  ;;  %v257_v3 = vld [vmem:[%s1009_s29 + $0x10] sm:$0xff]  ;;  %914 = vmatpush3.msk.msra.mxu1 %vm585_vm1, %v528_v17 }
   0xf   : > { %889 = vmatprep.mubr.msk.f32.mxu0 %vm272_vm0, %v255_v1  ;;  %v258_v4 = vld [vmem:[%s1009_s29 + $0x18] sm:$0xff]  ;;  %v259_v5 = vld [vmem:[%s1009_s29 + $0x20] sm:$0xff]  ;;  %v260_v6 = vld [vmem:[%s1009_s29 + $0x28] sm:$0xff] }
  0x10   : > { %890 = vmatmul.mubr.msk.f32.vlgmr.msra.gmra.mxu0 %vm272_vm0, %v256_v2  ;;  %v261_v7 = vld [vmem:[%s1009_s29 + $0x30] sm:$0xff]  ;;  %v262_v8 = vld [vmem:[%s1009_s29 + $0x38] sm:$0xff]  ;;  %v263_v9 = vld [vmem:[%s1009_s29 + $0x40] sm:$0xff] }
  0x11   : > { %892 = vmatprep.mubr.msk.f32.mxu0 %vm272_vm0, %v257_v3  ;;  %v264_v10 = vld [vmem:[%s1009_s29 + $0x48] sm:$0xff]  ;;  %v265_v11 = vld [vmem:[%s1009_s29 + $0x50] sm:$0xff]  ;;  %v266_v12 = vld [vmem:[%s1009_s29 + $0x58] sm:$0xff] }
  0x12   : > { %v267_v13 = vld [vmem:[%s1009_s29 + $0x60] sm:$0xff]  ;;  %v268_v14 = vld [vmem:[%s1009_s29 + $0x68] sm:$0xff]  ;;  %v269_v15 = vld [vmem:[%s1009_s29 + $0x70] sm:$0xff] }
  0x13   : > { %v270_v16 = vld [vmem:[%s1009_s29 + $0x78] sm:$0xff]  ;;  %v1055_v21 = vld [vmem:[%s1152_s3] ss:$0 sm:$0xff] }
  0x14   : > { %893 = vmatmul.mubr.msk.f32.gmra.mxu0 %vm272_vm0, %v258_v4 }
  0x15   : > { %895 = vmatprep.mubr.msk.f32.mxu0 %vm272_vm0, %v259_v5 }
  0x18   : > { %896 = vmatmul.mubr.msk.f32.gmra.mxu0 %vm272_vm0, %v260_v6 }
  0x19   : > { %898 = vmatprep.mubr.msk.f32.mxu0 %vm272_vm0, %v261_v7 }
  0x1c   : > { %899 = vmatmul.mubr.msk.f32.gmra.mxu0 %vm272_vm0, %v262_v8 }
  0x1d   : > { %901 = vmatprep.mubr.msk.f32.mxu0 %vm272_vm0, %v263_v9 }
  0x20   : > { %902 = vmatmul.mubr.msk.f32.gmra.mxu0 %vm272_vm0, %v264_v10 }
  0x21   : > { %904 = vmatprep.mubr.msk.f32.mxu0 %vm272_vm0, %v265_v11 }
  0x24   : > { %905 = vmatmul.mubr.msk.f32.gmra.mxu0 %vm272_vm0, %v266_v12 }
  0x25   : > { %907 = vmatprep.mubr.msk.f32.mxu0 %vm272_vm0, %v267_v13 }
  0x28   : > { %908 = vmatmul.mubr.msk.f32.gmra.mxu0 %vm272_vm0, %v268_v14 }
  0x29   : > { %910 = vmatprep.mubr.msk.f32.mxu0 %vm272_vm0, %v269_v15 }
  0x2c   : > { %911 = vmatmul.mubr.msk.f32.gmra.mxu0 %vm272_vm0, %v270_v16 }
  0xd0   : > { %v891_v19 = vpop.f32.mrf.mxu0 }
  0xd1   : > { %v474_v20 = vmul.f32 %v891_v19, %v1049_v18 }
  0xd2   : > { %v387_v22 = vpop.f32.mrf.mxu0 }
  0xd3   : > { %v473_v23 = vmul.f32 %v1049_v18, %v387_v22  ;;  %v497_v24 = vadd.f32 %v1055_v21, %v474_v20  ;;  %v833_v22 = vld [vmem:[%s1154_s5] ss:$0 sm:$0xff] }
  0xd4   : > { %v894_v25 = vpop.f32.mrf.mxu0 }
  0xd5   : > { %v476_v26 = vmul.f32 %v894_v25, %v1049_v18  ;;  %v496_v27 = vadd.f32 %v1055_v21, %v473_v23  ;;  %v513_v31 = vmax.f32 %v497_v24, 0.0 }
  0xd6   : > { %v397_v28 = vpop.f32.mrf.mxu0 }
  0xd7   : > { %v475_v29 = vmul.f32 %v1049_v18, %v397_v28  ;;  %v512_v30 = vmax.f32 %v496_v27, 0.0  ;;  %v499_v32 = vadd.f32 %v1055_v21, %v476_v26 }
  0xd8   : > { %v897_v33 = vpop.f32.mrf.mxu0 }
  0xd9   : > { %v498_v34 = vadd.f32 %v1055_v21, %v475_v29  ;;  %v478_v35 = vmul.f32 %v897_v33, %v1049_v18  ;;  %915 = vmatprep.mubr.msk.f32.mxu1 %vm536_vm2, %v512_v30  ;;  %v515_v39 = vmax.f32 %v499_v32, 0.0 }
  0xda   : > { %v407_v36 = vpop.f32.mrf.mxu0  ;;  %916 = vmatmul.mubr.msk.f32.vlgmr.msra.gmra.mxu1 %vm536_vm2, %v513_v31 }
  0xdb   : > { %v514_v37 = vmax.f32 %v498_v34, 0.0  ;;  %v477_v38 = vmul.f32 %v1049_v18, %v407_v36  ;;  %v501_v40 = vadd.f32 %v1055_v21, %v478_v35 }
  0xdc   : > { %v900_v41 = vpop.f32.mrf.mxu0 }
  0xdd   : > { %v500_v42 = vadd.f32 %v1055_v21, %v477_v38  ;;  %v480_v43 = vmul.f32 %v900_v41, %v1049_v18  ;;  %918 = vmatprep.mubr.msk.f32.mxu1 %vm536_vm2, %v514_v37  ;;  %v517_v47 = vmax.f32 %v501_v40, 0.0 }
  0xde   : > { %v417_v44 = vpop.f32.mrf.mxu0  ;;  %919 = vmatmul.mubr.msk.f32.gmra.mxu1 %vm536_vm2, %v515_v39 }
  0xdf   : > { %v516_v45 = vmax.f32 %v500_v42, 0.0  ;;  %v479_v46 = vmul.f32 %v1049_v18, %v417_v44  ;;  %v503_v48 = vadd.f32 %v1055_v21, %v480_v43 }
  0xe0   : > { %v903_v49 = vpop.f32.mrf.mxu0 }
  0xe1   : > { %v502_v50 = vadd.f32 %v1055_v21, %v479_v46  ;;  %v482_v51 = vmul.f32 %v903_v49, %v1049_v18  ;;  %921 = vmatprep.mubr.msk.f32.mxu1 %vm536_vm2, %v516_v45  ;;  %v519_v55 = vmax.f32 %v503_v48, 0.0 }
  0xe2   : > { %v427_v52 = vpop.f32.mrf.mxu0  ;;  %922 = vmatmul.mubr.msk.f32.gmra.mxu1 %vm536_vm2, %v517_v47 }
  0xe3   : > { %v518_v53 = vmax.f32 %v502_v50, 0.0  ;;  %v481_v54 = vmul.f32 %v1049_v18, %v427_v52  ;;  %v505_v56 = vadd.f32 %v1055_v21, %v482_v51 }
  0xe4   : > { %v906_v57 = vpop.f32.mrf.mxu0 }
  0xe5   : > { %v504_v58 = vadd.f32 %v1055_v21, %v481_v54  ;;  %v484_v59 = vmul.f32 %v906_v57, %v1049_v18  ;;  %924 = vmatprep.mubr.msk.f32.mxu1 %vm536_vm2, %v518_v53  ;;  %v521_v63 = vmax.f32 %v505_v56, 0.0 }
  0xe6   : > { %v437_v60 = vpop.f32.mrf.mxu0  ;;  %925 = vmatmul.mubr.msk.f32.gmra.mxu1 %vm536_vm2, %v519_v55 }
  0xe7   : > { %v520_v61 = vmax.f32 %v504_v58, 0.0  ;;  %v483_v62 = vmul.f32 %v1049_v18, %v437_v60  ;;  %v507_v0 = vadd.f32 %v1055_v21, %v484_v59 }
  0xe8   : > { %v909_v1 = vpop.f32.mrf.mxu0 }
  0xe9   : > { %v506_v2 = vadd.f32 %v1055_v21, %v483_v62  ;;  %v486_v3 = vmul.f32 %v909_v1, %v1049_v18  ;;  %927 = vmatprep.mubr.msk.f32.mxu1 %vm536_vm2, %v520_v61  ;;  %v523_v7 = vmax.f32 %v507_v0, 0.0 }
  0xea   : > { %v447_v4 = vpop.f32.mrf.mxu0  ;;  %928 = vmatmul.mubr.msk.f32.gmra.mxu1 %vm536_vm2, %v521_v63 }
  0xeb   : > { %v522_v5 = vmax.f32 %v506_v2, 0.0  ;;  %v485_v6 = vmul.f32 %v1049_v18, %v447_v4  ;;  %v509_v8 = vadd.f32 %v1055_v21, %v486_v3 }
  0xec   : > { %v912_v9 = vpop.f32.mrf.mxu0 }
  0xed   : > { %v508_v10 = vadd.f32 %v1055_v21, %v485_v6  ;;  %v488_v11 = vmul.f32 %v912_v9, %v1049_v18  ;;  %930 = vmatprep.mubr.msk.f32.mxu1 %vm536_vm2, %v522_v5  ;;  %v525_v15 = vmax.f32 %v509_v8, 0.0 }
  0xee   : > { %v457_v12 = vpop.f32.mrf.mxu0  ;;  %931 = vmatmul.mubr.msk.f32.gmra.mxu1 %vm536_vm2, %v523_v7 }
  0xef   : > { %v524_v13 = vmax.f32 %v508_v10, 0.0  ;;  %v487_v14 = vmul.f32 %v1049_v18, %v457_v12  ;;  %v511_v16 = vadd.f32 %v1055_v21, %v488_v11 }
  0xf1   : > { %v510_v17 = vadd.f32 %v1055_v21, %v487_v14  ;;  %933 = vmatprep.mubr.msk.f32.mxu1 %vm536_vm2, %v524_v13  ;;  %v527_v20 = vmax.f32 %v511_v16, 0.0 }
  0xf2   : > { %934 = vmatmul.mubr.msk.f32.gmra.mxu1 %vm536_vm2, %v525_v15 }
  0xf3   : > { %v526_v19 = vmax.f32 %v510_v17, 0.0 }
  0xf5   : > { %936 = vmatprep.mubr.msk.f32.mxu1 %vm536_vm2, %v526_v19 }
  0xf6   : > { %937 = vmatmul.mubr.msk.f32.gmra.mxu1 %vm536_vm2, %v527_v20 }
 0x19a   : > { %v917_v18 = vpop.f32.mrf.mxu1 }
 0x19b   : > { %v661_v21 = vadd.f32 %v917_v18, %v833_v22 }
 0x19c   : > { %v655_v23 = vpop.f32.mrf.mxu1 }
 0x19d   : > { %735 = vst.msk [vmem:[%s1112_s16 + $0x8] sm:$0xff] %vm272_vm0, %v661_v21  ;;  %v656_v24 = vadd.f32 %v833_v22, %v655_v23 }
 0x19e   : > { %v920_v25 = vpop.f32.mrf.mxu1 }
 0x19f   : > { %734 = vst.msk [vmem:[%s1112_s16] sm:$0xff] %vm272_vm0, %v656_v24  ;;  %v671_v26 = vadd.f32 %v920_v25, %v833_v22 }
 0x1a0   : > { %v665_v27 = vpop.f32.mrf.mxu1 }
 0x1a1   : > { %737 = vst.msk [vmem:[%s1112_s16 + $0x18] sm:$0xff] %vm272_vm0, %v671_v26  ;;  %v666_v28 = vadd.f32 %v833_v22, %v665_v27 }
 0x1a2   : > { %v923_v29 = vpop.f32.mrf.mxu1 }
 0x1a3   : > { %736 = vst.msk [vmem:[%s1112_s16 + $0x10] sm:$0xff] %vm272_vm0, %v666_v28  ;;  %v681_v30 = vadd.f32 %v923_v29, %v833_v22 }
 0x1a4   : > { %v675_v31 = vpop.f32.mrf.mxu1 }
 0x1a5   : > { %739 = vst.msk [vmem:[%s1112_s16 + $0x28] sm:$0xff] %vm272_vm0, %v681_v30  ;;  %v676_v32 = vadd.f32 %v833_v22, %v675_v31 }
 0x1a6   : > { %v926_v33 = vpop.f32.mrf.mxu1 }
 0x1a7   : > { %738 = vst.msk [vmem:[%s1112_s16 + $0x20] sm:$0xff] %vm272_vm0, %v676_v32  ;;  %v691_v34 = vadd.f32 %v926_v33, %v833_v22 }
 0x1a8   : > { %v685_v35 = vpop.f32.mrf.mxu1 }
 0x1a9   : > { %741 = vst.msk [vmem:[%s1112_s16 + $0x38] sm:$0xff] %vm272_vm0, %v691_v34  ;;  %v686_v36 = vadd.f32 %v833_v22, %v685_v35 }
 0x1aa   : > { %v929_v37 = vpop.f32.mrf.mxu1 }
 0x1ab   : > { %740 = vst.msk [vmem:[%s1112_s16 + $0x30] sm:$0xff] %vm272_vm0, %v686_v36  ;;  %v701_v38 = vadd.f32 %v929_v37, %v833_v22 }
 0x1ac   : > { %v695_v39 = vpop.f32.mrf.mxu1 }
 0x1ad   : > { %743 = vst.msk [vmem:[%s1112_s16 + $0x48] sm:$0xff] %vm272_vm0, %v701_v38  ;;  %v696_v40 = vadd.f32 %v833_v22, %v695_v39 }
 0x1ae   : > { %v932_v41 = vpop.f32.mrf.mxu1 }
 0x1af   : > { %742 = vst.msk [vmem:[%s1112_s16 + $0x40] sm:$0xff] %vm272_vm0, %v696_v40  ;;  %v711_v42 = vadd.f32 %v932_v41, %v833_v22 }
 0x1b0   : > { %v705_v43 = vpop.f32.mrf.mxu1 }
 0x1b1   : > { %745 = vst.msk [vmem:[%s1112_s16 + $0x58] sm:$0xff] %vm272_vm0, %v711_v42  ;;  %v706_v44 = vadd.f32 %v833_v22, %v705_v43 }
 0x1b2   : > { %v935_v45 = vpop.f32.mrf.mxu1 }
 0x1b3   : > { %744 = vst.msk [vmem:[%s1112_s16 + $0x50] sm:$0xff] %vm272_vm0, %v706_v44  ;;  %v721_v46 = vadd.f32 %v935_v45, %v833_v22 }
 0x1b4   : > { %v715_v47 = vpop.f32.mrf.mxu1 }
 0x1b5   : > { %747 = vst.msk [vmem:[%s1112_s16 + $0x68] sm:$0xff] %vm272_vm0, %v721_v46  ;;  %v716_v48 = vadd.f32 %v833_v22, %v715_v47 }
 0x1b6   : > { %v938_v49 = vpop.f32.mrf.mxu1 }
 0x1b7   : > { %746 = vst.msk [vmem:[%s1112_s16 + $0x60] sm:$0xff] %vm272_vm0, %v716_v48  ;;  %v731_v50 = vadd.f32 %v938_v49, %v833_v22 }
 0x1b8   : > { %v725_v51 = vpop.f32.mrf.mxu1 }
 0x1b9   : > { %749 = vst.msk [vmem:[%s1112_s16 + $0x78] sm:$0xff] %vm272_vm0, %v731_v50  ;;  %v726_v52 = vadd.f32 %v833_v22, %v725_v51 }
 0x1bb   : > { %748 = vst.msk [vmem:[%s1112_s16 + $0x70] sm:$0xff] %vm272_vm0, %v726_v52 }
 0x1bc PF: > { %s16_s21 = sadd.s32 1, %s953_s21  }
 0x1bd   : > { %p13_p4 = scmp.ge.s32.totalorder %s16_s21, 4  }
 0x1bf   :  { %15 = sbr.rel (!%p13_p4) target bundleno = 1 (0x1), region = 74 }

</bundles_post_ra>
